<compile_context>
chip_gen: v7x
topology: tpu7x:2x2x1
jax: 0.10.0
libtpu: 0.0.40
codegen_flags: <defaults>
</compile_context>

<pallas_src>
import numpy as np
import jax
import jax.numpy as jnp
from jax.experimental import pallas as pl
from jax.experimental.pallas import tpu as pltpu


def _round_up(x, m):
    return ((x + m - 1) // m) * m


# ---------------------------------------------------------------------------
# Kernel 1: fused (im2col) conv3x3-stride2 + folded BatchNorm + ReLU
# ---------------------------------------------------------------------------
def _conv_bn_relu_kernel(p_ref, w_ref, scale_ref, shift_ref, o_ref):
    # p_ref:     [tm, 9*Cin]  im2col patches (f32)
    # w_ref:     [9*Cin, Cout] conv weight (f32)
    # scale_ref: [1, Cout]    folded BN scale  = gamma / sqrt(var + eps)
    # shift_ref: [1, Cout]    folded BN shift  = beta + (conv_bias - mean) * scale
    # o_ref:     [tm, Cout]
    acc = jnp.dot(p_ref[...], w_ref[...], preferred_element_type=jnp.float32)
    y = acc * scale_ref[...] + shift_ref[...]
    o_ref[...] = jnp.maximum(y, 0.0).astype(o_ref.dtype)


def conv3x3_s2_bn_relu(x_nhwc, w_hwio, conv_bias, gamma, beta, mean, var,
                       eps=1e-5):
    """Conv2d(C,C,3,2,1) + BatchNorm2d (eval mode, folded) + ReLU, NHWC."""
    B, H, W, C = x_nhwc.shape
    Cout = w_hwio.shape[-1]
    Ho = (H + 2 - 3) // 2 + 1
    Wo = (W + 2 - 3) // 2 + 1

    # im2col patch extraction: pure data-layout glue done in plain JAX.
    # TODO(synk): pull the patch gather into the kernel via manual DMA to
    # avoid materializing the 9x-amplified patch tensor at very large shapes.
    xp = jnp.pad(x_nhwc, ((0, 0), (1, 1), (1, 1), (0, 0)))
    taps = [xp[:, kh:kh + 2 * Ho:2, kw:kw + 2 * Wo:2, :]
            for kh in range(3) for kw in range(3)]
    patches = jnp.stack(taps, axis=3).reshape(B * Ho * Wo, 9 * C)
    patches = patches.astype(jnp.float32)

    w_flat = w_hwio.reshape(9 * C, Cout).astype(jnp.float32)
    bn_scale = (gamma / jnp.sqrt(var + eps)).reshape(1, Cout).astype(jnp.float32)
    bn_shift = (beta + (conv_bias - mean) * bn_scale[0]).reshape(1, Cout)
    bn_shift = bn_shift.astype(jnp.float32)

    M = B * Ho * Wo
    Mp = _round_up(M, 8)
    if Mp != M:
        patches = jnp.pad(patches, ((0, Mp - M), (0, 0)))
    tm = min(Mp, 512)  # rows per block (multiple of 8)

    out = pl.pallas_call(
        _conv_bn_relu_kernel,
        out_shape=jax.ShapeDtypeStruct((Mp, Cout), jnp.float32),
        grid=(pl.cdiv(Mp, tm),),
        in_specs=[
            pl.BlockSpec((tm, 9 * C), lambda i: (i, 0)),
            pl.BlockSpec((9 * C, Cout), lambda i: (0, 0)),
            pl.BlockSpec((1, Cout), lambda i: (0, 0)),
            pl.BlockSpec((1, Cout), lambda i: (0, 0)),
        ],
        out_specs=pl.BlockSpec((tm, Cout), lambda i: (i, 0)),
        compiler_params=pltpu.CompilerParams(
            dimension_semantics=("parallel",),
            vmem_limit_bytes=64 * 1024 * 1024),
        cost_estimate=pl.CostEstimate(
            flops=2 * Mp * 9 * C * Cout,
            transcendentals=0,
            bytes_accessed=4 * (Mp * 9 * C + 9 * C * Cout + Mp * Cout)),
    )(patches, w_flat, bn_scale, bn_shift)

    return out[:M].reshape(B, Ho, Wo, Cout)


# ---------------------------------------------------------------------------
# Kernel 2: global average pool (adaptive_avg_pool2d to (1,1))
# ---------------------------------------------------------------------------
def _global_avg_pool_kernel(x_ref, o_ref):
    # x_ref: [tb, S, C] -> o_ref: [tb, C]
    o_ref[...] = jnp.mean(x_ref[...].astype(jnp.float32), axis=1).astype(o_ref.dtype)


def global_avg_pool(x_nhwc):
    B, H, W, C = x_nhwc.shape
    x = x_nhwc.reshape(B, H * W, C)
    tb = min(B, 256)
    return pl.pallas_call(
        _global_avg_pool_kernel,
        out_shape=jax.ShapeDtypeStruct((B, C), jnp.float32),
        grid=(pl.cdiv(B, tb),),
        in_specs=[pl.BlockSpec((tb, H * W, C), lambda i: (i, 0, 0))],
        out_specs=pl.BlockSpec((tb, C), lambda i: (i, 0)),
        compiler_params=pltpu.CompilerParams(dimension_semantics=("parallel",)),
    )(x)


# ---------------------------------------------------------------------------
# Kernel 3: cosine fully-connected layer (tiled, bf16 MXU, folded scale)
# ---------------------------------------------------------------------------
def _cosine_fc_kernel(scale_ref, x_ref, w_ref, o_ref):
    # scale_ref: SMEM (1,) f32  -- scale_cls
    # x_ref:     VMEM [tm, C]   f32 features
    # w_ref:     VMEM [C, tn]   bf16 pre-L2-normalized class weights
    # o_ref:     VMEM [tm, tn]  f32 logits
    x = x_ref[...].astype(jnp.float32)
    sumsq = jnp.sum(x * x, axis=1, keepdims=True)
    # F.normalize(p=2, dim=1, eps=1e-12): 1/max(||x||,eps) == rsqrt(max(sumsq, eps^2))
    inv = jax.lax.rsqrt(jnp.maximum(sumsq, 1e-24))
    # Fold scale_cls into the per-row inverse norm (no BxN output multiply).
    xn = (x * (inv * scale_ref[0])).astype(jnp.bfloat16)
    o_ref[...] = jnp.dot(xn, w_ref[...],
                         preferred_element_type=jnp.float32).astype(o_ref.dtype)


def prepare_cosine_weight(weight):
    """One-time weight prep (do this at weight-load/update time, not per call):
    L2-normalize rows of the [N, C] weight (lane-axis reduction), transpose
    once to [C, N], pad N to a lane-dense multiple of 128, cast to bf16."""
    N, C = weight.shape
    w = weight.astype(jnp.float32)
    inv = jax.lax.rsqrt(jnp.maximum(jnp.sum(w * w, axis=1, keepdims=True), 1e-24))
    w_t = (w * inv).T                                  # [C, N], unit columns
    Np = max(_round_up(N, 128), 128)
    if Np != N:
        w_t = jnp.pad(w_t, ((0, 0), (0, Np - N)))
    return w_t.astype(jnp.bfloat16)


def cosine_classifier_forward(x_in, w_t_prepared, num_classes, scale_cls,
                              bias=None):
    """x_in [B, C] f32, w_t_prepared [C, Np] bf16 (pre-normalized, padded)."""
    B, C = x_in.shape
    Cw, Np = w_t_prepared.shape
    assert Cw == C

    Bp = _round_up(B, 8)
    x = x_in.astype(jnp.float32)
    if Bp != B:
        x = jnp.pad(x, ((0, Bp - B), (0, 0)))   # zero rows -> zero logits, sliced off

    # Tile caps chosen so 2 x (tm*C f32 + C*tn bf16 + tm*tn f32) stays well
    # inside v7x's 64 MiB VMEM even for C up to a few thousand.
    tm = min(Bp, 256)
    tn = min(Np, 512)
    # TODO(synk): add a K (C) reduction grid axis with a f32 accumulator and
    # pre-computed row inv-norms if C ever grows beyond what a single block fits.

    out = pl.pallas_call(
        _cosine_fc_kernel,
        out_shape=jax.ShapeDtypeStruct((Bp, Np), jnp.float32),
        grid=(pl.cdiv(Bp, tm), pl.cdiv(Np, tn)),
        in_specs=[
            pl.BlockSpec(memory_space=pltpu.MemorySpace.SMEM),   # scale_cls scalar
            pl.BlockSpec((tm, C), lambda i, j: (i, 0)),          # feature rows
            pl.BlockSpec((C, tn), lambda i, j: (0, j)),          # class-weight cols
        ],
        out_specs=pl.BlockSpec((tm, tn), lambda i, j: (i, j)),
        compiler_params=pltpu.CompilerParams(
            dimension_semantics=("parallel", "parallel"),
            vmem_limit_bytes=64 * 1024 * 1024),
        cost_estimate=pl.CostEstimate(
            flops=2 * Bp * C * Np,
            transcendentals=Bp,
            bytes_accessed=4 * Bp * C + 2 * C * Np + 4 * Bp * Np),
    )(scale_cls.astype(jnp.float32), x, w_t_prepared)

    out = out[:B, :num_classes]
    if bias is not None:
        out = out + bias.reshape(1, -1)
    return out


# ---------------------------------------------------------------------------
# RotClassifier.forward
# ---------------------------------------------------------------------------
def rot_classifier_forward(x_nchw, params):
    # PyTorch uses NCHW; convert once to NHWC so channels sit on the lane axis.
    x = jnp.transpose(x_nchw, (0, 2, 3, 1)).astype(jnp.float32)
    # TODO(synk): BatchNorm is folded in eval mode (running stats); training-mode
    # batch statistics are not implemented in-kernel.
    x = conv3x3_s2_bn_relu(x, params["w1"], params["b1"], params["gamma1"],
                           params["beta1"], params["mean1"], params["var1"])
    x = conv3x3_s2_bn_relu(x, params["w2"], params["b2"], params["gamma2"],
                           params["beta2"], params["mean2"], params["var2"])
    feat = global_avg_pool(x)                                    # [B, dim]
    return cosine_classifier_forward(feat, params["w_cls_prepared"],
                                     params["num_classes"],
                                     params["scale_cls"], bias=None)


# ---------------------------------------------------------------------------
# Pure-JAX reference
# ---------------------------------------------------------------------------
def reference_forward(x_nchw, params, eps_bn=1e-5):
    x = jnp.transpose(x_nchw, (0, 2, 3, 1)).astype(jnp.float32)

    def block(x, w, b, g, be, m, v):
        y = jax.lax.conv_general_dilated(
            x, w, window_strides=(2, 2), padding=((1, 1), (1, 1)),
            dimension_numbers=("NHWC", "HWIO", "NHWC"),
            precision=jax.lax.Precision.HIGHEST)
        y = y + b.reshape(1, 1, 1, -1)
        y = (y - m) / jnp.sqrt(v + eps_bn) * g + be
        return jnp.maximum(y, 0.0)

    x = block(x, params["w1"], params["b1"], params["gamma1"],
              params["beta1"], params["mean1"], params["var1"])
    x = block(x, params["w2"], params["b2"], params["gamma2"],
              params["beta2"], params["mean2"], params["var2"])
    feat = jnp.mean(x, axis=(1, 2))                              # [B, dim]
    xf = feat / jnp.maximum(jnp.linalg.norm(feat, axis=1, keepdims=True), 1e-12)
    w = params["w_cls"]
    wn = w / jnp.maximum(jnp.linalg.norm(w, axis=1, keepdims=True), 1e-12)
    return (xf @ wn.T) * params["scale_cls"][0]


if __name__ == "__main__":
    dim = 32
    cls_num = 4
    batch = 2
    H = W = 16

    key = jax.random.PRNGKey(0)
    ks = jax.random.split(key, 14)

    def normal(k, shape, s=1.0):
        return jax.random.normal(k, shape, dtype=jnp.float32) * s

    params = {
        "w1": normal(ks[0], (3, 3, dim, dim), np.sqrt(2.0 / (9 * dim))),
        "b1": normal(ks[1], (dim,), 0.1),
        "gamma1": 1.0 + normal(ks[2], (dim,), 0.1),
        "beta1": normal(ks[3], (dim,), 0.1),
        "mean1": normal(ks[4], (dim,), 0.1),
        "var1": 1.0 + 0.1 * jnp.abs(normal(ks[5], (dim,))),
        "w2": normal(ks[6], (3, 3, dim, dim), np.sqrt(2.0 / (9 * dim))),
        "b2": normal(ks[7], (dim,), 0.1),
        "gamma2": 1.0 + normal(ks[8], (dim,), 0.1),
        "beta2": normal(ks[9], (dim,), 0.1),
        "mean2": normal(ks[10], (dim,), 0.1),
        "var2": 1.0 + 0.1 * jnp.abs(normal(ks[11], (dim,))),
        "w_cls": normal(ks[12], (cls_num, dim), np.sqrt(2.0 / dim)),
        "scale_cls": jnp.full((1,), 10.0, dtype=jnp.float32),
        "num_classes": cls_num,
    }
    params["w_cls_prepared"] = prepare_cosine_weight(params["w_cls"])

    x = normal(ks[13], (batch, dim, H, W))

    out = rot_classifier_forward(x, params)
    out = jax.block_until_ready(out)
    assert out.shape == (batch, cls_num)

    ref = reference_forward(x, params)
    # bf16 MXU operands in the cosine matmul (scale 10 logits) -> looser tolerance.
    np.testing.assert_allclose(np.asarray(out), np.asarray(ref),
                               rtol=5e-2, atol=1e-1)

    print("KERNEL_OK")
</pallas_src>

<mosaic_0001>
module attributes {stable_mosaic.version = 11 : i64} {
  func.func @_conv_bn_relu_kernel(%arg0: i32, %arg1: memref<128x288xf32, #tpu.memory_space<vmem>>, %arg2: memref<288x32xf32, #tpu.memory_space<vmem>>, %arg3: memref<1x32xf32, #tpu.memory_space<vmem>>, %arg4: memref<1x32xf32, #tpu.memory_space<vmem>>, %arg5: memref<128x32xf32, #tpu.memory_space<vmem>>) attributes {dimension_semantics = [#tpu.dimension_semantics<parallel>], iteration_bounds = array<i64: 1>, scalar_prefetch = 0 : i64, scratch_operands = 0 : i64, tpu.core_type = #tpu.core_type<tc>, window_params = [{transform_indices = @transform_0, window_bounds = array<i64: 128, 288>}, {pipeline_mode = #tpu.pipeline_mode<synchronous>, transform_indices = @transform_1, window_bounds = array<i64: 288, 32>}, {pipeline_mode = #tpu.pipeline_mode<synchronous>, transform_indices = @transform_2, window_bounds = array<i64: 1, 32>}, {pipeline_mode = #tpu.pipeline_mode<synchronous>, transform_indices = @transform_3, window_bounds = array<i64: 1, 32>}, {transform_indices = @transform_4, window_bounds = array<i64: 128, 32>}]} {
    %c0 = arith.constant 0 : index
    %c0_0 = arith.constant 0 : index
    %0 = vector.load %arg1[%c0, %c0_0] : memref<128x288xf32, #tpu.memory_space<vmem>>, vector<128x288xf32>
    %c0_1 = arith.constant 0 : index
    %c0_2 = arith.constant 0 : index
    %1 = vector.load %arg2[%c0_1, %c0_2] : memref<288x32xf32, #tpu.memory_space<vmem>>, vector<288x32xf32>
    %cst = arith.constant dense<0.000000e+00> : vector<128x32xf32>
    %2 = tpu.matmul %0, %1, %cst {dimension_numbers = #tpu.dot_dimension_numbers<[1], [0], [0], [1], [0, 0, 1, 1], [], []>} : vector<128x288xf32>, vector<288x32xf32>, vector<128x32xf32> -> vector<128x32xf32>
    %c0_3 = arith.constant 0 : index
    %c0_4 = arith.constant 0 : index
    %3 = vector.load %arg3[%c0_3, %c0_4] : memref<1x32xf32, #tpu.memory_space<vmem>>, vector<1x32xf32>
    %4 = vector.broadcast %3 : vector<1x32xf32> to vector<128x32xf32>
    %5 = arith.mulf %2, %4 : vector<128x32xf32>
    %c0_5 = arith.constant 0 : index
    %c0_6 = arith.constant 0 : index
    %6 = vector.load %arg4[%c0_5, %c0_6] : memref<1x32xf32, #tpu.memory_space<vmem>>, vector<1x32xf32>
    %7 = vector.broadcast %6 : vector<1x32xf32> to vector<128x32xf32>
    %8 = arith.addf %5, %7 : vector<128x32xf32>
    %cst_7 = arith.constant 0.000000e+00 : f32
    %9 = vector.broadcast %cst_7 : f32 to vector<128x32xf32>
    %10 = arith.maximumf %8, %9 : vector<128x32xf32>
    %c0_8 = arith.constant 0 : index
    %c0_9 = arith.constant 0 : index
    %11 = vector.load %arg5[%c0_8, %c0_9] : memref<128x32xf32, #tpu.memory_space<vmem>>, vector<128x32xf32>
    tpu.vector_store %arg5[%c0_8, %c0_9], %10 {strides = array<i32>} : memref<128x32xf32, #tpu.memory_space<vmem>>, vector<128x32xf32>,
    return
  }
  func.func @transform_0(%arg0: i32) -> (i32, i32) {
    %c0_i32 = arith.constant 0 : i32
    %c0_i32_0 = arith.constant 0 : i32
    return %arg0, %c0_i32 : i32, i32
  }
  func.func @transform_1(%arg0: i32) -> (i32, i32) {
    %c0_i32 = arith.constant 0 : i32
    %c0_i32_0 = arith.constant 0 : i32
    %c0_i32_1 = arith.constant 0 : i32
    return %c0_i32, %c0_i32_0 : i32, i32
  }
  func.func @transform_2(%arg0: i32) -> (i32, i32) {
    %c0_i32 = arith.constant 0 : i32
    %c0_i32_0 = arith.constant 0 : i32
    %c0_i32_1 = arith.constant 0 : i32
    return %c0_i32, %c0_i32_0 : i32, i32
  }
  func.func @transform_3(%arg0: i32) -> (i32, i32) {
    %c0_i32 = arith.constant 0 : i32
    %c0_i32_0 = arith.constant 0 : i32
    %c0_i32_1 = arith.constant 0 : i32
    return %c0_i32, %c0_i32_0 : i32, i32
  }
  func.func @transform_4(%arg0: i32) -> (i32, i32) {
    %c0_i32 = arith.constant 0 : i32
    %c0_i32_0 = arith.constant 0 : i32
    return %arg0, %c0_i32 : i32, i32
  }
}

</mosaic_0001>

<bundles_post_ra>
// kernel: tpu_custom_call.1
= control target key start
LH: loop header
LB: loop body
LE: loop exit
PB: predicated region body
PF: predicated region fallthrough
CT: control target
= control target key end

     0   :  { %9 = vsyncpa [#allocation3], 0  ;;  %s1102_s0 = inlined_call_operand.hbm [shape: f32[128,288], index: 0, kind: input, shape index: {}]   ;;  %s1103_s1 = inlined_call_operand.hbm [shape: f32[288,32], index: 1, kind: input, shape index: {}]   ;;  %s1104_s2 = inlined_call_operand.hbm [shape: f32[1,32], index: 2, kind: input, shape index: {}]   ;;  %s1105_s3 = inlined_call_operand.hbm [shape: f32[1,32], index: 3, kind: input, shape index: {}]   ;;  %s1106_s4 = inlined_call_operand.hbm [shape: f32[128,32], index: 4, kind: output, shape index: {}]  }
   0x1   :  { %10 = vsyncpa [#allocation6], 0 }
   0x2   :  { %11 = vsyncpa [#allocation9], 0 }
   0x3   :  { %12 = vsyncpa [#allocation4], 0  ;;  %s922_s15 = smov [#allocation5]   ;;  %s804_s19 = scalar_lea.hbm %s1103_s1, 4608 }
   0x4   :  { %s30_s16 = sshll.u32 %s922_s15, 4  ;;  %p805_p0 = scmp.ne.s32.totalorder %s1103_s1, %s804_s19  ;;  %s31_s16 = int_to_ptr.vmem [resolvable:$true] %s30_s16 }
   0x5   :  { %p808_p1 = scmp.lt.u32.totalorder %s804_s19, %s1103_s1 }
   0x7   :  { %p810_p2 = pnand %p808_p1, %p805_p0 }
   0x9   :  { %813 = shalt.err (!%p810_p2)
}
   0xa   :  { %s814_s24 = scalar_lea.vmem %s31_s16, 4608  ;;  %p819_p4 = scmp.lt.s32.totalorder %s31_s16, %s31_s16 }
   0xb   :  { %p815_p3 = scmp.ne.s32.totalorder %s31_s16, %s814_s24  ;;  %p820_p5 = scmp.lt.s32.totalorder %s814_s24, %s814_s24 }
   0xd   :  { %p821_p6 = por %p820_p5, %p819_p4 }
   0xf   :  { %p822_p7 = pnand %p821_p6, %p815_p3 }
  0x11   :  { %825 = shalt.err (!%p822_p7)
}
  0x12   :  { %s923_s25 = smov 128   ;;  %s924_s26 = smov 8  }
  0x13   :  { %36 = dma.hbm_to_vmem [thread:$0]  %s1103_s1, 4608, %s31_s16, [#allocation6], %s923_s25, %s923_s25, %s924_s26  }
  0x14   :  { %s925_s29 = smov [#allocation2]   ;;  %s826_s7 = scalar_lea.hbm %s1102_s0, 6144 }
  0x15   :  { %s18_s30 = sshll.u32 %s925_s29, 4  ;;  %p827_p8 = scmp.ne.s32.totalorder %s1102_s0, %s826_s7  ;;  %s19_s30 = int_to_ptr.vmem [resolvable:$true] %s18_s30 }
  0x16   :  { %p830_p9 = scmp.lt.u32.totalorder %s826_s7, %s1102_s0 }
  0x18   :  { %p832_p10 = pnand %p830_p9, %p827_p8 }
  0x1a   :  { %835 = shalt.err (!%p832_p10)
}
  0x1b   :  { %s836_s12 = scalar_lea.vmem %s19_s30, 6144  ;;  %p841_p12 = scmp.lt.s32.totalorder %s19_s30, %s19_s30 }
  0x1c   :  { %p837_p11 = scmp.ne.s32.totalorder %s19_s30, %s836_s12  ;;  %p842_p13 = scmp.lt.s32.totalorder %s836_s12, %s836_s12 }
  0x1e   :  { %p843_p0 = por %p842_p13, %p841_p12 }
  0x20   :  { %p844_p1 = pnand %p843_p0, %p837_p11 }
  0x22   :  { %847 = shalt.err (!%p844_p1)
}
  0x23   :  { %s926_s1 = smov 384   ;;  %s927_s13 = smov 24  }
  0x24   :  { %24 = dma.hbm_to_vmem [thread:$0]  %s1102_s0, 6144, %s19_s30, [#allocation3], %s926_s1, %s926_s1, %s927_s13  }
  0x25   :  { %s928_s16 = smov [#allocation7]   ;;  %s929_s18 = smov [#allocation8]  }
  0x26   :  { %s43_s17 = sshll.u32 %s928_s16, 4  ;;  %s53_s19 = sshll.u32 %s929_s18, 4  ;;  %s44_s17 = int_to_ptr.vmem [resolvable:$true] %s43_s17  ;;  %s54_s19 = int_to_ptr.vmem [resolvable:$true] %s53_s19 }
  0x27   :  { %s848_s22 = scalar_lea.hbm %s1104_s2, 16 }
  0x28   :  { %p849_p2 = scmp.ne.s32.totalorder %s1104_s2, %s848_s22  ;;  %p852_p3 = scmp.lt.u32.totalorder %s848_s22, %s1104_s2 }
  0x2a   :  { %p854_p4 = pnand %p852_p3, %p849_p2 }
  0x2c   :  { %857 = shalt.err (!%p854_p4)
}
  0x2d   :  { %s858_s0 = scalar_lea.vmem %s44_s17, 16  ;;  %s862_s29 = scalar_lea.vmem %s44_s17, 32 }
  0x2e   :  { %p859_p5 = scmp.ne.s32.totalorder %s44_s17, %s858_s0  ;;  %p863_p6 = scmp.lt.s32.totalorder %s44_s17, %s44_s17 }
  0x2f   :  { %p864_p7 = scmp.lt.s32.totalorder %s862_s29, %s858_s0 }
  0x31   :  { %p865_p8 = por %p864_p7, %p863_p6 }
  0x33   :  { %p866_p9 = pnand %p865_p8, %p859_p5 }
  0x35   :  { %869 = shalt.err (!%p866_p9)
}
  0x36   :  { %46 = dma.hbm_to_vmem [thread:$0]  %s1104_s2, 16, %s44_s17, [#allocation6]  }
  0x37   :  { %s870_s8 = scalar_lea.hbm %s1105_s3, 16 }
  0x38   :  { %p871_p10 = scmp.ne.s32.totalorder %s1105_s3, %s870_s8  ;;  %p874_p11 = scmp.lt.u32.totalorder %s870_s8, %s1105_s3 }
  0x3a   :  { %p876_p12 = pnand %p874_p11, %p871_p10 }
  0x3c   :  { %879 = shalt.err (!%p876_p12)
}
  0x3d   :  { %s880_s1 = scalar_lea.vmem %s54_s19, 16  ;;  %s884_s13 = scalar_lea.vmem %s54_s19, 32 }
  0x3e   :  { %p881_p13 = scmp.ne.s32.totalorder %s54_s19, %s880_s1  ;;  %p885_p0 = scmp.lt.s32.totalorder %s54_s19, %s54_s19 }
  0x3f   :  { %p886_p1 = scmp.lt.s32.totalorder %s884_s13, %s880_s1 }
  0x41   :  { %p887_p2 = por %p886_p1, %p885_p0 }
  0x43   :  { %p888_p3 = pnand %p887_p2, %p881_p13 }
  0x45   :  { %891 = shalt.err (!%p888_p3)
}
  0x46   :  { %56 = dma.hbm_to_vmem [thread:$0]  %s1105_s3, 16, %s54_s19, [#allocation9]  }
  0x47   :  { %914 = dma.done.wait [#allocation3], 6144  }
  0x48   :  { %915 = vsyncadd [#allocation3], 4294961152 }
  0x49   :  { %916 = dma.done.wait [#allocation6], 4624  }
  0x4a   :  { %917 = vsyncadd [#allocation6], 4294962672 }
  0x4b   :  { %918 = dma.done.wait [#allocation9], 16  }
  0x4c   :  { %919 = vsyncadd [#allocation9], 4294967280  ;;  %v133_v0 = vld [vmem:[#allocation5 + $0x80] sm:$0xff]  ;;  %v134_v1 = vld [vmem:[#allocation5 + $0x88] sm:$0xff]  ;;  %vm153_vm0 = vcmask 261120   ;;  %s930_s3 = smov [#allocation10]  }
  0x4d   :  { %v117_v2 = vld [vmem:[#allocation5] sm:$0xff]  ;;  %v739_v3 = vpack.c.bf16 %v134_v1, %v133_v0  ;;  %v118_v4 = vld [vmem:[#allocation5 + $0x8] sm:$0xff]  ;;  %v135_v5 = vld [vmem:[#allocation5 + $0x90] sm:$0xff]  ;;  %s575_s15 = sshll.u32 %s930_s3, 4  ;;  %s576_s15 = int_to_ptr.vmem [resolvable:$true] %s575_s15 }
  0x4e   :  { %v136_v6 = vld [vmem:[#allocation5 + $0x98] sm:$0xff]  ;;  %v741_v7 = vpack.c.bf16 %v118_v4, %v117_v2  ;;  %v119_v9 = vld [vmem:[#allocation5 + $0x10] sm:$0xff]  ;;  %v137_v11 = vld [vmem:[#allocation5 + $0xa0] sm:$0xff]  ;;  %s892_s16 = scalar_lea.vmem %s576_s15, 2048  ;;  %p897_p5 = scmp.lt.s32.totalorder %s576_s15, %s576_s15 }
  0x4f   :  { %v743_v8 = vpack.c.bf16 %v136_v6, %v135_v5  ;;  %v120_v10 = vld [vmem:[#allocation5 + $0x18] sm:$0xff]  ;;  %740 = vmatprep.subr.bf16.mxu0 %v739_v3  ;;  %779 = vmatprep.subr.bf16.mxu1 %v739_v3  ;;  %v138_v12 = vld [vmem:[#allocation5 + $0xa8] sm:$0xff]  ;;  %v121_v15 = vld [vmem:[#allocation5 + $0x20] sm:$0xff]  ;;  %p893_p4 = scmp.ne.s32.totalorder %s576_s15, %s892_s16  ;;  %p898_p6 = scmp.lt.s32.totalorder %s892_s16, %s892_s16 }
  0x50   :  { %742 = vmatpush3.bf16.msra.mxu0 %v741_v7  ;;  %787 = vmatpush3.bf16.msra.mxu1 %v741_v7  ;;  %v745_v13 = vpack.c.bf16 %v120_v10, %v119_v9  ;;  %v747_v14 = vpack.c.bf16 %v138_v12, %v137_v11  ;;  %v122_v16 = vld [vmem:[#allocation5 + $0x28] sm:$0xff]  ;;  %v139_v17 = vld [vmem:[#allocation5 + $0xb0] sm:$0xff]  ;;  %v140_v18 = vld [vmem:[#allocation5 + $0xb8] sm:$0xff] }
  0x51   :  { %744 = vmatprep.subr.bf16.mxu0 %v743_v8  ;;  %780 = vmatprep.subr.bf16.mxu1 %v743_v8  ;;  %v749_v19 = vpack.c.bf16 %v122_v16, %v121_v15  ;;  %v751_v20 = vpack.c.bf16 %v140_v18, %v139_v17  ;;  %v123_v21 = vld [vmem:[#allocation5 + $0x30] sm:$0xff]  ;;  %v124_v22 = vld [vmem:[#allocation5 + $0x38] sm:$0xff]  ;;  %v141_v23 = vld [vmem:[#allocation5 + $0xc0] sm:$0xff]  ;;  %p899_p7 = por %p898_p6, %p897_p5 }
  0x52   :  { %v142_v24 = vld [vmem:[#allocation5 + $0xc8] sm:$0xff]  ;;  %v753_v27 = vpack.c.bf16 %v124_v22, %v123_v21  ;;  %v125_v29 = vld [vmem:[#allocation5 + $0x40] sm:$0xff]  ;;  %v143_v31 = vld [vmem:[#allocation5 + $0xd0] sm:$0xff] }
  0x53   :  { %v70_v25 = vld [vmem:[#allocation2 + $0x8] sm:$0xff]  ;;  %v755_v28 = vpack.c.bf16 %v142_v24, %v141_v23  ;;  %v144_v32 = vld [vmem:[#allocation5 + $0xd8] sm:$0xff]  ;;  %v127_v35 = vld [vmem:[#allocation5 + $0x50] sm:$0xff]  ;;  %p900_p8 = pnand %p899_p7, %p893_p4 }
  0x54   :  { %746 = vmatpush3.bf16.msra.mxu0 %v745_v13  ;;  %788 = vmatpush3.bf16.msra.mxu1 %v745_v13  ;;  %v106_v26 = vld [vmem:[#allocation2 + $0x128] sm:$0xff]  ;;  %v759_v34 = vpack.c.bf16 %v144_v32, %v143_v31  ;;  %v128_v36 = vld [vmem:[#allocation5 + $0x58] sm:$0xff]  ;;  %v145_v37 = vld [vmem:[#allocation5 + $0xe0] sm:$0xff] }
  0x55   :  { %748 = vmatprep.subr.bf16.mxu0 %v747_v14  ;;  %781 = vmatprep.subr.bf16.mxu1 %v747_v14  ;;  %v126_v30 = vld [vmem:[#allocation5 + $0x48] sm:$0xff]  ;;  %v761_v39 = vpack.c.bf16 %v128_v36, %v127_v35  ;;  %v129_v41 = vld [vmem:[#allocation5 + $0x60] sm:$0xff]  ;;  %v147_v43 = vld [vmem:[#allocation5 + $0xf0] sm:$0xff] }
  0x56   :  { %266 = vmatprep.mubr.f32.mxu0 %v70_v25  ;;  %326 = vmatprep.mubr.f32.mxu1 %v106_v26  ;;  %v757_v33 = vpack.c.bf16 %v126_v30, %v125_v29  ;;  %v146_v38 = vld [vmem:[#allocation5 + $0xe8] sm:$0xff]  ;;  %v148_v44 = vld [vmem:[#allocation5 + $0xf8] sm:$0xff]  ;;  %v131_v47 = vld [vmem:[#allocation5 + $0x70] sm:$0xff] }
  0x57   :  { %v763_v40 = vpack.c.bf16 %v146_v38, %v145_v37  ;;  %v130_v42 = vld [vmem:[#allocation5 + $0x68] sm:$0xff]  ;;  %v767_v46 = vpack.c.bf16 %v148_v44, %v147_v43  ;;  %v132_v48 = vld [vmem:[#allocation5 + $0x78] sm:$0xff]  ;;  %v149_v49 = vld [vmem:[#allocation5 + $0x100] sm:$0xff] }
  0x58   :  { %750 = vmatpush3.bf16.msra.mxu0 %v749_v19  ;;  %789 = vmatpush3.bf16.msra.mxu1 %v749_v19  ;;  %v765_v45 = vpack.c.bf16 %v130_v42, %v129_v41  ;;  %v150_v50 = vld [vmem:[#allocation5 + $0x108] sm:$0xff]  ;;  %v769_v51 = vpack.c.bf16 %v132_v48, %v131_v47  ;;  %v151_v53 = vld [vmem:[#allocation5 + $0x110] sm:$0xff]  ;;  %v152_v54 = vld [vmem:[#allocation5 + $0x118] sm:$0xff] }
  0x59   :  { %752 = vmatprep.subr.bf16.mxu0 %v751_v20  ;;  %782 = vmatprep.subr.bf16.mxu1 %v751_v20  ;;  %v771_v52 = vpack.c.bf16 %v150_v50, %v149_v49  ;;  %v69_v55 = vld [vmem:[#allocation2] sm:$0xff]  ;;  %v775_v58 = vpack.c.bf16 %v152_v54, %v151_v53  ;;  %v72_v60 = vld [vmem:[#allocation2 + $0x18] sm:$0xff]  ;;  %v75_v0 = vld [vmem:[#allocation2 + $0x30] sm:$0xff] }
  0x5a   :  { %v105_v56 = vld [vmem:[#allocation2 + $0x120] sm:$0xff]  ;;  %v108_v61 = vld [vmem:[#allocation2 + $0x138] sm:$0xff]  ;;  %v111_v1 = vld [vmem:[#allocation2 + $0x150] sm:$0xff] }
  0x5b   :  { %v73_v57 = vld [vmem:[#allocation2 + $0x20] sm:$0xff]  ;;  %v76_v62 = vld [vmem:[#allocation2 + $0x38] sm:$0xff]  ;;  %v79_v2 = vld [vmem:[#allocation2 + $0x50] sm:$0xff] }
  0x5c   :  { %754 = vmatpush3.bf16.msra.mxu0 %v753_v27  ;;  %790 = vmatpush3.bf16.msra.mxu1 %v753_v27  ;;  %v109_v59 = vld [vmem:[#allocation2 + $0x140] sm:$0xff]  ;;  %v112_v63 = vld [vmem:[#allocation2 + $0x158] sm:$0xff]  ;;  %v115_v3 = vld [vmem:[#allocation2 + $0x170] sm:$0xff] }
  0x5d   :  { %756 = vmatprep.subr.bf16.mxu0 %v755_v28  ;;  %783 = vmatprep.subr.bf16.mxu1 %v755_v28  ;;  %v78_v4 = vld [vmem:[#allocation2 + $0x48] sm:$0xff]  ;;  %v71_v7 = vld [vmem:[#allocation2 + $0x10] sm:$0xff]  ;;  %v81_v8 = vld [vmem:[#allocation2 + $0x60] sm:$0xff] }
  0x5e   :  { %v114_v5 = vld [vmem:[#allocation2 + $0x168] sm:$0xff]  ;;  %v85_v10 = vld [vmem:[#allocation2 + $0x80] sm:$0xff]  ;;  %v84_v12 = vld [vmem:[#allocation2 + $0x78] sm:$0xff] }
  0x5f   :  { %v82_v6 = vld [vmem:[#allocation2 + $0x68] sm:$0xff]  ;;  %v77_v11 = vld [vmem:[#allocation2 + $0x40] sm:$0xff]  ;;  %v80_v13 = vld [vmem:[#allocation2 + $0x58] sm:$0xff] }
  0x60   :  { %758 = vmatpush3.bf16.msra.mxu0 %v757_v33  ;;  %791 = vmatpush3.bf16.msra.mxu1 %v757_v33  ;;  %v74_v9 = vld [vmem:[#allocation2 + $0x28] sm:$0xff]  ;;  %v88_v14 = vld [vmem:[#allocation2 + $0x98] sm:$0xff]  ;;  %v83_v15 = vld [vmem:[#allocation2 + $0x70] sm:$0xff] }
  0x61   :  { %760 = vmatprep.subr.bf16.mxu0 %v759_v34  ;;  %784 = vmatprep.subr.bf16.mxu1 %v759_v34  ;;  %v87_v16 = vld [vmem:[#allocation2 + $0x90] sm:$0xff]  ;;  %v86_v17 = vld [vmem:[#allocation2 + $0x88] sm:$0xff]  ;;  %v89_v19 = vld [vmem:[#allocation2 + $0xa0] sm:$0xff] }
  0x62   :  { %v91_v18 = vld [vmem:[#allocation2 + $0xb0] sm:$0xff]  ;;  %v90_v20 = vld [vmem:[#allocation2 + $0xa8] sm:$0xff]  ;;  %v92_v21 = vld [vmem:[#allocation2 + $0xb8] sm:$0xff] }
  0x63   :  { %v94_v22 = vld [vmem:[#allocation2 + $0xc8] sm:$0xff]  ;;  %v95_v23 = vld [vmem:[#allocation2 + $0xd0] sm:$0xff]  ;;  %v93_v24 = vld [vmem:[#allocation2 + $0xc0] sm:$0xff] }
  0x64   :  { %762 = vmatpush3.bf16.msra.mxu0 %v761_v39  ;;  %792 = vmatpush3.bf16.msra.mxu1 %v761_v39  ;;  %v98_v25 = vld [vmem:[#allocation2 + $0xe8] sm:$0xff]  ;;  %v97_v26 = vld [vmem:[#allocation2 + $0xe0] sm:$0xff]  ;;  %v96_v28 = vld [vmem:[#allocation2 + $0xd8] sm:$0xff] }
  0x65   :  { %764 = vmatprep.subr.bf16.mxu0 %v763_v40  ;;  %785 = vmatprep.subr.bf16.mxu1 %v763_v40  ;;  %v101_v27 = vld [vmem:[#allocation2 + $0x100] sm:$0xff]  ;;  %v104_v29 = vld [vmem:[#allocation2 + $0x118] sm:$0xff]  ;;  %v107_v31 = vld [vmem:[#allocation2 + $0x130] sm:$0xff] }
  0x66   :  { %v100_v30 = vld [vmem:[#allocation2 + $0xf8] sm:$0xff]  ;;  %v99_v32 = vld [vmem:[#allocation2 + $0xf0] sm:$0xff]  ;;  %v110_v33 = vld [vmem:[#allocation2 + $0x148] sm:$0xff] }
  0x67   :  { %v103_v34 = vld [vmem:[#allocation2 + $0x110] sm:$0xff]  ;;  %v113_v35 = vld [vmem:[#allocation2 + $0x160] sm:$0xff]  ;;  %v102_v36 = vld [vmem:[#allocation2 + $0x108] sm:$0xff] }
  0x68   :  { %766 = vmatpush3.bf16.msra.mxu0 %v765_v45  ;;  %793 = vmatpush3.bf16.msra.mxu1 %v765_v45  ;;  %v116_v37 = vld [vmem:[#allocation2 + $0x178] sm:$0xff] }
  0x69   :  { %768 = vmatprep.subr.bf16.mxu0 %v767_v46  ;;  %786 = vmatprep.subr.bf16.mxu1 %v767_v46 }
  0x6c   :  { %770 = vmatpush3.bf16.msra.mxu0 %v769_v51  ;;  %794 = vmatpush3.bf16.msra.mxu1 %v769_v51 }
  0x6d   :  { %772 = vmatprep.subr.bf16.mxu1 %v771_v52 }
  0x6f   :  { %267 = vmatmul.mubr.f32.vlgmr.msra.gmra.mrb[0].mxu0 %v69_v55  ;;  %327 = vmatmul.mubr.f32.vlgmr.msra.gmra.mrb[0].mxu1 %v105_v56 }
  0x70   :  { %774 = vmatpush3.bf16.msra.mxu1 %v771_v52  ;;  %271 = vmatprep.mubr.f32.mxu0 %v73_v57 }
  0x71   :  { %331 = vmatprep.mubr.f32.mxu1 %v109_v59  ;;  %776 = vmatprep.subr.bf16.mxu1 %v775_v58 }
  0x73   :  { %272 = vmatmul.mubr.f32.gmra.mrb[2].mxu0 %v72_v60  ;;  %332 = vmatmul.mubr.f32.gmra.mrb[2].mxu1 %v108_v61 }
  0x74   :  { %276 = vmatprep.mubr.f32.mxu0 %v76_v62  ;;  %336 = vmatprep.mubr.f32.mxu1 %v112_v63 }
  0x75   :  { %778 = vmatpush3.bf16.msra.mxu1 %v775_v58 }
  0x77   :  { %277 = vmatmul.mubr.f32.gmra.mrb[4].mxu0 %v75_v0  ;;  %337 = vmatmul.mubr.f32.gmra.mrb[4].mxu1 %v111_v1  ;;  %v1031_v0 = vld [vmem:[#allocation7] ss:$0 sm:$0xff] }
  0x78   :  { %281 = vmatprep.mubr.f32.mxu0 %v79_v2  ;;  %341 = vmatprep.mubr.f32.mxu1 %v115_v3 }
  0x7b   :  { %282 = vmatmul.mubr.f32.gmra.mrb[6].mxu0 %v78_v4  ;;  %342 = vmatmul.mubr.f32.gmra.mrb[6].mxu1 %v114_v5  ;;  %v1033_v4 = vld [vmem:[#allocation8] ss:$0 sm:$0xff] }
  0x7c   :  { %286 = vmatprep.mubr.f32.mxu0 %v82_v6  ;;  %715 = vmatprep.mubr.msk.f32.mxu1 %vm153_vm0, %v71_v7 }
  0x7f   :  { %287 = vmatmul.mubr.f32.gmra.mrb[8].mxu0 %v81_v8  ;;  %716 = vmatmul.mubr.msk.f32.vlgmr.msra.gmra.mrb[8].mxu1 %vm153_vm0, %v74_v9 }
  0x80   :  { %291 = vmatprep.mubr.f32.mxu0 %v85_v10  ;;  %718 = vmatprep.mubr.msk.f32.mxu1 %vm153_vm0, %v77_v11 }
  0x83   :  { %292 = vmatmul.mubr.f32.gmra.mrb[10].mxu0 %v84_v12  ;;  %719 = vmatmul.mubr.msk.f32.gmra.mrb[10].mxu1 %vm153_vm0, %v80_v13 }
  0x84   :  { %296 = vmatprep.mubr.f32.mxu0 %v88_v14  ;;  %721 = vmatprep.mubr.msk.f32.mxu1 %vm153_vm0, %v83_v15 }
  0x87   :  { %297 = vmatmul.mubr.f32.gmra.mrb[12].mxu0 %v87_v16  ;;  %722 = vmatmul.mubr.msk.f32.gmra.mrb[12].mxu1 %vm153_vm0, %v86_v17 }
  0x88   :  { %301 = vmatprep.mubr.f32.mxu0 %v91_v18  ;;  %724 = vmatprep.mubr.msk.f32.mxu1 %vm153_vm0, %v89_v19 }
  0x8b   :  { %302 = vmatmul.mubr.f32.gmra.mrb[14].mxu0 %v90_v20  ;;  %725 = vmatmul.mubr.msk.f32.gmra.mrb[14].mxu1 %vm153_vm0, %v92_v21 }
  0x8c   :  { %306 = vmatprep.mubr.f32.mxu0 %v94_v22  ;;  %727 = vmatprep.mubr.msk.f32.mxu1 %vm153_vm0, %v95_v23 }
  0x8f   :  { %307 = vmatmul.mubr.f32.gmra.mrb[16].mxu0 %v93_v24  ;;  %728 = vmatmul.mubr.msk.f32.gmra.mrb[16].mxu1 %vm153_vm0, %v98_v25 }
  0x90   :  { %311 = vmatprep.mubr.f32.mxu0 %v97_v26  ;;  %730 = vmatprep.mubr.msk.f32.mxu1 %vm153_vm0, %v101_v27 }
  0x93   :  { %312 = vmatmul.mubr.f32.gmra.mrb[18].mxu0 %v96_v28  ;;  %731 = vmatmul.mubr.msk.f32.gmra.mrb[18].mxu1 %vm153_vm0, %v104_v29 }
  0x94   :  { %316 = vmatprep.mubr.f32.mxu0 %v100_v30  ;;  %733 = vmatprep.mubr.msk.f32.mxu1 %vm153_vm0, %v107_v31 }
  0x97   :  { %317 = vmatmul.mubr.f32.gmra.mrb[20].mxu0 %v99_v32  ;;  %734 = vmatmul.mubr.msk.f32.gmra.mrb[20].mxu1 %vm153_vm0, %v110_v33 }
  0x98   :  { %321 = vmatprep.mubr.f32.mxu0 %v103_v34  ;;  %736 = vmatprep.mubr.msk.f32.mxu1 %vm153_vm0, %v113_v35 }
  0x9b   :  { %322 = vmatmul.mubr.f32.gmra.mrb[22].mxu0 %v102_v36  ;;  %737 = vmatmul.mubr.msk.f32.gmra.mrb[22].mxu1 %vm153_vm0, %v116_v37 }
 0x142   :  { %v639_v38 = vpop.f32.mrb[0].mxu0  ;;  %v675_v39 = vpop.f32.mrb[0].mxu1 }
 0x143   :  { %v640_v40 = vpop.f32.mrb[1].mxu0  ;;  %v676_v41 = vpop.f32.mrb[1].mxu1 }
 0x144   :  { %v641_v42 = vadd.f32 %v640_v40, %v639_v38  ;;  %v1023_v43 = vadd.f32 %v676_v41, %v675_v39 }
 0x146   :  { %v642_v44 = vpop.f32.mrb[2].mxu0  ;;  %v678_v45 = vpop.f32.mrb[2].mxu1 }
 0x147   :  { %v643_v46 = vpop.f32.mrb[3].mxu0  ;;  %v679_v47 = vpop.f32.mrb[3].mxu1 }
 0x148   :  { %v644_v48 = vadd.f32 %v643_v46, %v642_v44  ;;  %v1025_v49 = vadd.f32 %v679_v47, %v678_v45 }
 0x14a   :  { %v645_v50 = vpop.f32.mrb[4].mxu0  ;;  %v681_v51 = vpop.f32.mrb[4].mxu1 }
 0x14b   :  { %v646_v52 = vpop.f32.mrb[5].mxu0  ;;  %v682_v53 = vpop.f32.mrb[5].mxu1 }
 0x14c   :  { %v647_v54 = vadd.f32 %v646_v52, %v645_v50  ;;  %v1027_v55 = vadd.f32 %v682_v53, %v681_v51 }
 0x14e   :  { %v648_v56 = vpop.f32.mrb[6].mxu0  ;;  %v684_v57 = vpop.f32.mrb[6].mxu1 }
 0x14f   :  { %v649_v58 = vpop.f32.mrb[7].mxu0  ;;  %v685_v59 = vpop.f32.mrb[7].mxu1 }
 0x150   :  { %v650_v60 = vadd.f32 %v649_v58, %v648_v56  ;;  %v1029_v61 = vadd.f32 %v685_v59, %v684_v57 }
 0x152   :  { %v651_v62 = vpop.f32.mrb[8].mxu0  ;;  %v717_v63 = vpop.f32.mrb[8].mxu1 }
 0x153   :  { %v419_v1 = vadd.f32 %v717_v63, %v644_v48  ;;  %v652_v2 = vpop.f32.mrb[9].mxu0  ;;  %v413_v3 = vpop.f32.mrb[9].mxu1 }
 0x154   :  { %v653_v5 = vadd.f32 %v652_v2, %v651_v62  ;;  %v414_v6 = vadd.f32 %v641_v42, %v413_v3 }
 0x155   :  { %v500_v7 = vmul.f32 %v1031_v0, %v419_v1 }
 0x156   :  { %v499_v8 = vmul.f32 %v1031_v0, %v414_v6  ;;  %v654_v9 = vpop.f32.mrb[10].mxu0  ;;  %v720_v10 = vpop.f32.mrb[10].mxu1 }
 0x157   :  { %v523_v11 = vadd.f32 %v1033_v4, %v500_v7  ;;  %v429_v12 = vadd.f32 %v720_v10, %v650_v60  ;;  %v655_v13 = vpop.f32.mrb[11].mxu0  ;;  %v423_v14 = vpop.f32.mrb[11].mxu1 }
 0x158   :  { %v522_v15 = vadd.f32 %v1033_v4, %v499_v8  ;;  %v656_v16 = vadd.f32 %v655_v13, %v654_v9  ;;  %v424_v17 = vadd.f32 %v647_v54, %v423_v14 }
 0x159   :  { %v539_v18 = vmax.f32 %v523_v11, 0.0  ;;  %v502_v19 = vmul.f32 %v1031_v0, %v429_v12 }
 0x15a   :  { %v538_v20 = vmax.f32 %v522_v15, 0.0  ;;  %v501_v21 = vmul.f32 %v1031_v0, %v424_v17  ;;  %v657_v22 = vpop.f32.mrb[12].mxu0  ;;  %v723_v23 = vpop.f32.mrb[12].mxu1 }
 0x15b   :  { %555 = vst.msk [vmem:[#allocation10 + $0x8] sm:$0xff] %vm153_vm0, %v539_v18  ;;  %v525_v24 = vadd.f32 %v1033_v4, %v502_v19  ;;  %v439_v25 = vadd.f32 %v723_v23, %v656_v16  ;;  %v658_v26 = vpop.f32.mrb[13].mxu0  ;;  %v433_v27 = vpop.f32.mrb[13].mxu1 }
 0x15c   :  { %554 = vst.msk [vmem:[#allocation10] sm:$0xff] %vm153_vm0, %v538_v20  ;;  %v524_v28 = vadd.f32 %v1033_v4, %v501_v21  ;;  %v659_v29 = vadd.f32 %v658_v26, %v657_v22  ;;  %v434_v30 = vadd.f32 %v653_v5, %v433_v27 }
 0x15d   :  { %v541_v31 = vmax.f32 %v525_v24, 0.0  ;;  %v504_v32 = vmul.f32 %v1031_v0, %v439_v25 }
 0x15e   :  { %v540_v33 = vmax.f32 %v524_v28, 0.0  ;;  %v503_v34 = vmul.f32 %v1031_v0, %v434_v30  ;;  %v660_v35 = vpop.f32.mrb[14].mxu0  ;;  %v726_v36 = vpop.f32.mrb[14].mxu1 }
 0x15f   :  { %557 = vst.msk [vmem:[#allocation10 + $0x18] sm:$0xff] %vm153_vm0, %v541_v31  ;;  %v527_v37 = vadd.f32 %v1033_v4, %v504_v32  ;;  %v661_v38 = vpop.f32.mrb[15].mxu0  ;;  %v443_v39 = vpop.f32.mrb[15].mxu1 }
 0x160   :  { %556 = vst.msk [vmem:[#allocation10 + $0x10] sm:$0xff] %vm153_vm0, %v540_v33  ;;  %v526_v40 = vadd.f32 %v1033_v4, %v503_v34  ;;  %v662_v41 = vadd.f32 %v661_v38, %v660_v35  ;;  %v444_v42 = vadd.f32 %v659_v29, %v443_v39 }
 0x161   :  { %v543_v44 = vmax.f32 %v527_v37, 0.0 }
 0x162   :  { %v542_v45 = vmax.f32 %v526_v40, 0.0  ;;  %v449_v46 = vadd.f32 %v726_v36, %v662_v41  ;;  %v505_v47 = vmul.f32 %v1031_v0, %v444_v42  ;;  %v663_v48 = vpop.f32.mrb[16].mxu0  ;;  %v729_v50 = vpop.f32.mrb[16].mxu1 }
 0x163   :  { %559 = vst.msk [vmem:[#allocation10 + $0x28] sm:$0xff] %vm153_vm0, %v543_v44  ;;  %v664_v51 = vpop.f32.mrb[17].mxu0  ;;  %v453_v52 = vpop.f32.mrb[17].mxu1 }
 0x164   :  { %558 = vst.msk [vmem:[#allocation10 + $0x20] sm:$0xff] %vm153_vm0, %v542_v45  ;;  %v506_v53 = vmul.f32 %v1031_v0, %v449_v46  ;;  %v528_v54 = vadd.f32 %v1033_v4, %v505_v47  ;;  %v665_v56 = vadd.f32 %v664_v51, %v663_v48 }
 0x166   :  { %v529_v57 = vadd.f32 %v1033_v4, %v506_v53  ;;  %v544_v58 = vmax.f32 %v528_v54, 0.0  ;;  %v454_v59 = vadd.f32 %v665_v56, %v453_v52  ;;  %v666_v60 = vpop.f32.mrb[18].mxu0  ;;  %v732_v62 = vpop.f32.mrb[18].mxu1 }
 0x167   :  { %v667_v63 = vpop.f32.mrb[19].mxu0  ;;  %v463_v1 = vpop.f32.mrb[19].mxu1 }
 0x168   :  { %v545_v2 = vmax.f32 %v529_v57, 0.0  ;;  %560 = vst.msk [vmem:[#allocation10 + $0x30] sm:$0xff] %vm153_vm0, %v544_v58  ;;  %v507_v3 = vmul.f32 %v1031_v0, %v454_v59  ;;  %v668_v5 = vadd.f32 %v667_v63, %v666_v60 }
 0x16a   :  { %561 = vst.msk [vmem:[#allocation10 + $0x38] sm:$0xff] %vm153_vm0, %v545_v2  ;;  %v530_v6 = vadd.f32 %v1033_v4, %v507_v3  ;;  %v459_v7 = vadd.f32 %v729_v50, %v668_v5  ;;  %v669_v8 = vpop.f32.mrb[20].mxu0  ;;  %v735_v9 = vpop.f32.mrb[20].mxu1 }
 0x16b   :  { %v479_v10 = vadd.f32 %v735_v9, %v1025_v49  ;;  %v670_v11 = vpop.f32.mrb[21].mxu0  ;;  %v473_v12 = vpop.f32.mrb[21].mxu1 }
 0x16c   :  { %v546_v13 = vmax.f32 %v530_v6, 0.0  ;;  %v508_v14 = vmul.f32 %v1031_v0, %v459_v7  ;;  %v671_v15 = vadd.f32 %v670_v11, %v669_v8  ;;  %v474_v16 = vadd.f32 %v1023_v43, %v473_v12 }
 0x16d   :  { %v512_v17 = vmul.f32 %v1031_v0, %v479_v10 }
 0x16e   :  { %562 = vst.msk [vmem:[#allocation10 + $0x40] sm:$0xff] %vm153_vm0, %v546_v13  ;;  %v531_v18 = vadd.f32 %v1033_v4, %v508_v14  ;;  %v464_v19 = vadd.f32 %v671_v15, %v463_v1  ;;  %v511_v20 = vmul.f32 %v1031_v0, %v474_v16  ;;  %v672_v21 = vpop.f32.mrb[22].mxu0  ;;  %v738_v22 = vpop.f32.mrb[22].mxu1 }
 0x16f   :  { %v535_v49 = vadd.f32 %v1033_v4, %v512_v17  ;;  %v489_v23 = vadd.f32 %v738_v22, %v1029_v61  ;;  %v673_v24 = vpop.f32.mrb[23].mxu0  ;;  %v483_v25 = vpop.f32.mrb[23].mxu1 }
 0x170   :  { %v547_v26 = vmax.f32 %v531_v18, 0.0  ;;  %v509_v43 = vmul.f32 %v1031_v0, %v464_v19  ;;  %v534_v27 = vadd.f32 %v1033_v4, %v511_v20  ;;  %v674_v28 = vadd.f32 %v673_v24, %v672_v21 }
 0x171   :  { %v551_v29 = vmax.f32 %v535_v49, 0.0  ;;  %v514_v30 = vmul.f32 %v1031_v0, %v489_v23  ;;  %v484_v31 = vadd.f32 %v1027_v55, %v483_v25 }
 0x172   :  { %563 = vst.msk [vmem:[#allocation10 + $0x48] sm:$0xff] %vm153_vm0, %v547_v26  ;;  %v532_v32 = vadd.f32 %v1033_v4, %v509_v43  ;;  %v550_v33 = vmax.f32 %v534_v27, 0.0  ;;  %v469_v34 = vadd.f32 %v732_v62, %v674_v28 }
 0x173   :  { %567 = vst.msk [vmem:[#allocation10 + $0x68] sm:$0xff] %vm153_vm0, %v551_v29  ;;  %v537_v61 = vadd.f32 %v1033_v4, %v514_v30  ;;  %v513_v35 = vmul.f32 %v1031_v0, %v484_v31 }
 0x174   :  { %v548_v36 = vmax.f32 %v532_v32, 0.0  ;;  %566 = vst.msk [vmem:[#allocation10 + $0x60] sm:$0xff] %vm153_vm0, %v550_v33  ;;  %v510_v37 = vmul.f32 %v1031_v0, %v469_v34 }
 0x175   :  { %v553_v38 = vmax.f32 %v537_v61, 0.0  ;;  %v536_v55 = vadd.f32 %v1033_v4, %v513_v35 }
 0x176   :  { %564 = vst.msk [vmem:[#allocation10 + $0x50] sm:$0xff] %vm153_vm0, %v548_v36  ;;  %v533_v39 = vadd.f32 %v1033_v4, %v510_v37 }
 0x177   :  { %569 = vst.msk [vmem:[#allocation10 + $0x78] sm:$0xff] %vm153_vm0, %v553_v38  ;;  %v552_v40 = vmax.f32 %v536_v55, 0.0 }
 0x178   :  { %v549_v41 = vmax.f32 %v533_v39, 0.0 }
 0x179   :  { %568 = vst.msk [vmem:[#allocation10 + $0x70] sm:$0xff] %vm153_vm0, %v552_v40 }
 0x17a   :  { %565 = vst.msk [vmem:[#allocation10 + $0x58] sm:$0xff] %vm153_vm0, %v549_v41 }
 0x17b   :  { %903 = shalt.err (!%p900_p8)
}
 0x17c   :  { %s904_s19 = scalar_lea.hbm %s1106_s4, 2048 }
 0x17d   :  { %p905_p9 = scmp.ne.s32.totalorder %s1106_s4, %s904_s19  ;;  %p908_p10 = scmp.lt.u32.totalorder %s904_s19, %s1106_s4 }
 0x17f   :  { %p910_p11 = pnand %p908_p10, %p905_p9 }
 0x181   :  { %913 = shalt.err (!%p910_p11)
}
 0x182   :  { %581 = dma.vmem_to_hbm [thread:$0]  %s576_s15, 2048, %s1106_s4, [#allocation4], %s923_s25, %s923_s25, %s924_s26  }
 0x183   :  { %920 = dma.done.wait [#allocation4], 2048  }
 0x184   :  { %921 = vsyncadd [#allocation4], 4294965248 }
 0x185   :  { %585 = vsyncpa [#allocation3], 1 }
 0x186   :  { %586 = vsyncpa [#allocation6], 1 }
 0x187   :  { %587 = vsyncpa [#allocation9], 1 }
 0x188   :  { %588 = vsyncpa [#allocation4], 1 }

</bundles_post_ra>
